<compile_context>
chip_gen: v7x
topology: tpu7x:2x2x1
jax: 0.10.0
libtpu: 0.0.40
codegen_flags: <defaults>
</compile_context>

<pallas_src>
import math

import jax
import jax.numpy as jnp
from jax.experimental import pallas as pl
from jax.experimental.pallas import tpu as pltpu


def _round_up(x, m):
    return ((x + m - 1) // m) * m


def _cdiv(a, b):
    return (a + b - 1) // b


def _vmem_budget_bytes():
    """~75% of this generation's physical VMEM (leaves compiler headroom)."""
    try:
        cap = pltpu.get_tpu_info().vmem_capacity_bytes
    except Exception:
        cap = 64 * 1024 * 1024  # conservative (v7x-sized) fallback
    return int(cap * 3 // 4)


def linear_kernel(x_ref, wt_ref, b_ref, o_ref):
    # x_ref: (tm, in_f)  wt_ref: (in_f, tn)  b_ref: (1, tn)  o_ref: (tm, tn)
    y = jnp.dot(x_ref[...], wt_ref[...], preferred_element_type=jnp.float32)
    o_ref[...] = (y + b_ref[...].astype(jnp.float32)).astype(o_ref.dtype)


def _linear_forward(x2d, wt_p, b_p, out_f, out_dtype):
    batch, in_f = x2d.shape
    in_f_w, out_p = wt_p.shape
    assert in_f == in_f_w, "weight / input feature mismatch"
    itemsize = jnp.dtype(x2d.dtype).itemsize

    # ---- N (output-feature) tile: a divisor of out_p, multiple of 128 ------
    if out_p <= 512:
        tn = out_p
    elif out_p % 512 == 0:
        tn = 512
    elif out_p % 256 == 0:
        tn = 256
    else:
        tn = 128

    # ---- batch tile from the per-generation VMEM budget --------------------
    vmem_budget = _vmem_budget_bytes()
    resident = 2 * (in_f * tn + tn) * itemsize      # weight + bias (dbl-buffered)
    per_row = 2 * (in_f + tn) * itemsize            # x + out tiles (dbl-buffered)
    avail = max(vmem_budget // 2 - resident, per_row * 8)
    max_tm = max(8, min(4096, (avail // per_row) // 8 * 8))

    n_bt = max(1, _cdiv(batch, max_tm))
    # v7x has 2 TensorCores: make sure the parallel grid has >= 2 programs
    # once the batch is big enough to be worth splitting.
    if n_bt * (out_p // tn) < 2 and batch >= 256:
        n_bt = 2
    tm = _round_up(_cdiv(batch, n_bt), 8)           # near-divisor of batch
    batch_p = _round_up(batch, tm)

    # Pad batch rows only when strictly needed (no K padding of x).
    if batch_p != batch:
        x_in = jnp.zeros((batch_p, in_f), x2d.dtype).at[:batch, :].set(x2d)
    else:
        x_in = x2d

    # Advisory cost estimate: logical (unpadded) work.
    cost = pl.CostEstimate(
        flops=2 * batch * in_f * out_f,
        transcendentals=0,
        bytes_accessed=(batch * in_f + in_f * out_f + out_f + batch * out_f)
        * itemsize,
    )

    need = (2 * tm * in_f + 2 * tm * tn + 2 * in_f * tn + 2 * tn) * itemsize
    vmem_limit = int(min(max(2 * need, 4 * 1024 * 1024), vmem_budget))

    # Grid order (j, i): the weight column block (indexed by j only) stays
    # VMEM-resident while x / out tiles stream over the batch axis.
    out_padded = pl.pallas_call(
        linear_kernel,
        out_shape=jax.ShapeDtypeStruct((batch_p, out_p), out_dtype),
        grid=(out_p // tn, batch_p // tm),
        in_specs=[
            pl.BlockSpec((tm, in_f), lambda j, i: (i, 0)),   # x: streamed
            pl.BlockSpec((in_f, tn), lambda j, i: (0, j)),   # W^T col block
            pl.BlockSpec((1, tn), lambda j, i: (0, j)),      # bias col block
        ],
        out_specs=pl.BlockSpec((tm, tn), lambda j, i: (i, j)),
        compiler_params=pltpu.CompilerParams(
            dimension_semantics=("parallel", "parallel"),
            vmem_limit_bytes=vmem_limit,
        ),
        cost_estimate=cost,
    )(x_in, wt_p, b_p)

    if batch_p != batch or out_p != out_f:
        out_padded = out_padded[:batch, :out_f]
    return out_padded


class LinearRegressionPallas:
    """Pallas equivalent of LinearRegressionTorch: forward(x) = x @ W.T + b."""

    def __init__(self, weight, bias, compute_dtype=None):
        out_f, in_f = weight.shape
        self.in_f, self.out_f = in_f, out_f
        # Optional bf16 compute halves HBM bytes; accumulation stays f32.
        self.compute_dtype = compute_dtype or weight.dtype

        out_p = _round_up(out_f, 128)
        # Pre-transposed + out-padded parameters, prepared ONCE here.
        wt = weight.T.astype(self.compute_dtype)
        self.wt_p = (
            jnp.zeros((in_f, out_p), self.compute_dtype).at[:, :out_f].set(wt)
        )
        self.b_p = (
            jnp.zeros((1, out_p), jnp.float32)
            .at[0, :out_f]
            .set(bias.astype(jnp.float32))
        )

    def __call__(self, x):
        lead = x.shape[:-1]
        assert x.shape[-1] == self.in_f, "input feature mismatch"
        out_dtype = x.dtype
        x2d = x.reshape(-1, self.in_f).astype(self.compute_dtype)
        out = _linear_forward(x2d, self.wt_p, self.b_p, self.out_f, out_dtype)
        return out.reshape(*lead, self.out_f)


if __name__ == "__main__":
    # LinearRegressionTorch(input_size, output_size)
    input_size = 8
    output_size = 4
    batch = 16

    key = jax.random.PRNGKey(0)
    kx, kw, kb = jax.random.split(key, 3)

    # nn.Linear default init: uniform in [-1/sqrt(fan_in), 1/sqrt(fan_in)].
    bound = 1.0 / math.sqrt(input_size)
    weight = jax.random.uniform(
        kw, (output_size, input_size), jnp.float32, minval=-bound, maxval=bound
    )
    bias = jax.random.uniform(
        kb, (output_size,), jnp.float32, minval=-bound, maxval=bound
    )
    x = jax.random.normal(kx, (batch, input_size), jnp.float32)

    model = LinearRegressionPallas(weight, bias)
    out = jax.block_until_ready(model(x))

    # Reference (same math as torch nn.Linear).
    ref = x @ weight.T + bias
    assert out.shape == (batch, output_size)
    assert jnp.allclose(out, ref, atol=1e-5, rtol=1e-5)

    print("KERNEL_OK")
</pallas_src>

<mosaic_0001>
module attributes {stable_mosaic.version = 11 : i64} {
  func.func @linear_kernel(%arg0: i32, %arg1: i32, %arg2: memref<16x8xf32, #tpu.memory_space<vmem>>, %arg3: memref<8x128xf32, #tpu.memory_space<vmem>>, %arg4: memref<1x128xf32, #tpu.memory_space<vmem>>, %arg5: memref<16x128xf32, #tpu.memory_space<vmem>>) attributes {dimension_semantics = [#tpu.dimension_semantics<parallel>, #tpu.dimension_semantics<parallel>], iteration_bounds = array<i64: 1, 1>, scalar_prefetch = 0 : i64, scratch_operands = 0 : i64, tpu.core_type = #tpu.core_type<tc>, window_params = [{transform_indices = @transform_0, window_bounds = array<i64: 16, 8>}, {transform_indices = @transform_1, window_bounds = array<i64: 8, 128>}, {transform_indices = @transform_2, window_bounds = array<i64: 1, 128>}, {transform_indices = @transform_3, window_bounds = array<i64: 16, 128>}]} {
    %c0 = arith.constant 0 : index
    %c0_0 = arith.constant 0 : index
    %0 = vector.load %arg2[%c0, %c0_0] : memref<16x8xf32, #tpu.memory_space<vmem>>, vector<16x8xf32>
    %c0_1 = arith.constant 0 : index
    %c0_2 = arith.constant 0 : index
    %1 = vector.load %arg3[%c0_1, %c0_2] : memref<8x128xf32, #tpu.memory_space<vmem>>, vector<8x128xf32>
    %cst = arith.constant dense<0.000000e+00> : vector<16x128xf32>
    %2 = tpu.matmul %0, %1, %cst {dimension_numbers = #tpu.dot_dimension_numbers<[1], [0], [0], [1], [0, 0, 1, 1], [], []>} : vector<16x8xf32>, vector<8x128xf32>, vector<16x128xf32> -> vector<16x128xf32>
    %c0_3 = arith.constant 0 : index
    %c0_4 = arith.constant 0 : index
    %3 = vector.load %arg4[%c0_3, %c0_4] : memref<1x128xf32, #tpu.memory_space<vmem>>, vector<1x128xf32>
    %4 = vector.broadcast %3 : vector<1x128xf32> to vector<16x128xf32>
    %5 = arith.addf %2, %4 : vector<16x128xf32>
    %c0_5 = arith.constant 0 : index
    %c0_6 = arith.constant 0 : index
    %6 = vector.load %arg5[%c0_5, %c0_6] : memref<16x128xf32, #tpu.memory_space<vmem>>, vector<16x128xf32>
    tpu.vector_store %arg5[%c0_5, %c0_6], %5 {strides = array<i32>} : memref<16x128xf32, #tpu.memory_space<vmem>>, vector<16x128xf32>,
    return
  }
  func.func @transform_0(%arg0: i32, %arg1: i32) -> (i32, i32) {
    %c0_i32 = arith.constant 0 : i32
    %c0_i32_0 = arith.constant 0 : i32
    return %arg1, %c0_i32 : i32, i32
  }
  func.func @transform_1(%arg0: i32, %arg1: i32) -> (i32, i32) {
    %c0_i32 = arith.constant 0 : i32
    %c0_i32_0 = arith.constant 0 : i32
    return %c0_i32, %arg0 : i32, i32
  }
  func.func @transform_2(%arg0: i32, %arg1: i32) -> (i32, i32) {
    %c0_i32 = arith.constant 0 : i32
    %c0_i32_0 = arith.constant 0 : i32
    return %c0_i32, %arg0 : i32, i32
  }
  func.func @transform_3(%arg0: i32, %arg1: i32) -> (i32, i32) {
    %c0_i32 = arith.constant 0 : i32
    return %arg1, %arg0 : i32, i32
  }
}

</mosaic_0001>

<bundles_post_ra>
// kernel: tpu_custom_call.1
= control target key start
LH: loop header
LB: loop body
LE: loop exit
PB: predicated region body
PF: predicated region fallthrough
CT: control target
= control target key end

     0   :  { %vm25_vm0 = vcmask 64512   ;;  %s210_s0 = inlined_call_operand.vmem [shape: f32[16,8], index: 0, kind: input, shape index: {}]   ;;  %s211_s1 = inlined_call_operand.vmem [shape: f32[8,128], index: 1, kind: input, shape index: {}]   ;;  %s212_s2 = inlined_call_operand.vmem [shape: f32[1,128], index: 2, kind: input, shape index: {}]   ;;  %s213_s3 = inlined_call_operand.hbm [shape: f32[16,128], index: 3, kind: output, shape index: {}]  }
   0x1   :  { %v17_v0 = vld [vmem:[%s211_s1] sm:$0xff]  ;;  %v16_v2 = vld [vmem:[%s210_s0 + $0x8] sm:$0xff] }
   0x2   :  { %v15_v1 = vld [vmem:[%s210_s0] sm:$0xff]  ;;  %131 = vmatprep.subr.mxu0 %v17_v0 }
   0x3   :  { %133 = vmatprep.mubr.msk.f32.mxu0 %vm25_vm0, %v15_v1 }
   0x4   :  { %8 = vsyncpa [#allocation3], 0  ;;  %132 = vmatpush3.msra.mxu0 %v17_v0  ;;  %v125_v3 = vld [vmem:[%s212_s2] ss:$0 sm:$0xff]  ;;  %s163_s20 = smov [#allocation2]  }
   0x5   :  { %134 = vmatmul.mubr.msk.f32.vlgmr.msra.gmra.mrb[0].mxu0 %vm25_vm0, %v16_v2  ;;  %s114_s1 = sshll.u32 %s163_s20, 4  ;;  %s115_s1 = int_to_ptr.vmem [resolvable:$true] %s114_s1 }
   0x6   :  { %s139_s21 = scalar_lea.vmem %s115_s1, 256  ;;  %p144_p1 = scmp.lt.s32.totalorder %s115_s1, %s115_s1 }
   0x7   :  { %p140_p0 = scmp.ne.s32.totalorder %s115_s1, %s139_s21  ;;  %p145_p2 = scmp.lt.s32.totalorder %s139_s21, %s139_s21 }
   0x9   :  { %p146_p3 = por %p145_p2, %p144_p1 }
   0xb   :  { %p147_p4 = pnand %p146_p3, %p140_p0 }
  0xd8   :  { %v135_v4 = vpop.f32.mrb[0].mxu0 }
  0xd9   :  { %v104_v5 = vadd.f32 %v135_v4, %v125_v3  ;;  %v98_v6 = vpop.f32.mrb[1].mxu0 }
  0xda   :  { %v99_v7 = vadd.f32 %v125_v3, %v98_v6 }
  0xdb   :  { %108 = vst [vmem:[#allocation2 + $0x8] sm:$0xff] %v104_v5 }
  0xdc   :  { %107 = vst [vmem:[#allocation2] sm:$0xff] %v99_v7 }
  0xdd   :  { %150 = shalt.err (!%p147_p4)
}
  0xde   :  { %s151_s2 = scalar_lea.hbm %s213_s3, 256 }
  0xdf   :  { %p152_p5 = scmp.ne.s32.totalorder %s213_s3, %s151_s2  ;;  %p155_p6 = scmp.lt.u32.totalorder %s151_s2, %s213_s3 }
  0xe1   :  { %p157_p7 = pnand %p155_p6, %p152_p5 }
  0xe3   :  { %160 = shalt.err (!%p157_p7)
}
  0xe4   :  { %s164_s27 = smov 128   ;;  %s165_s28 = smov 8  }
  0xe5   :  { %120 = dma.vmem_to_hbm [thread:$0]  %s115_s1, 256, %s213_s3, [#allocation3], %s164_s27, %s164_s27, %s165_s28  }
  0xe6   :  { %161 = dma.done.wait [#allocation3], 256  }
  0xe7   :  { %162 = vsyncadd [#allocation3], 4294967040 }
  0xe8   :  { %124 = vsyncpa [#allocation3], 1 }

</bundles_post_ra>
